<compile_context>
chip_gen: v6e
topology: v6e:2x2x1
jax: 0.10.0
libtpu: 0.0.40
codegen_flags: <defaults>
</compile_context>

<pallas_src>
import jax
import jax.numpy as jnp
from jax.experimental import pallas as pl
from jax.experimental.pallas import tpu as pltpu


# ---------------------------------------------------------------------------
# Pallas kernel: fused fc1 -> relu -> fc2 -> relu -> output, transposed layout
# ---------------------------------------------------------------------------
def ncf_mlp_kernel(xT_ref,                      # (F_pad, TILE_B)  fused features, batch on lanes
                   w1T_ref, b1T_ref,            # (H1, F_pad), (H1, 1)
                   w2T_ref, b2T_ref,            # (H2, H1),   (H2, 1)
                   w3_ref, b3_ref,              # (H2, 1),    (1, 1)
                   out_ref):                    # (1, TILE_B)
    # fc1 (scalar-feature linears already folded into w1T/b1T) -> relu
    h1 = jnp.dot(w1T_ref[...], xT_ref[...],
                 preferred_element_type=jnp.float32) + b1T_ref[...]
    h1 = jnp.maximum(h1, 0.0)                                    # (H1, TILE_B)

    # fc2 -> relu
    h2 = jnp.dot(w2T_ref[...], h1,
                 preferred_element_type=jnp.float32) + b2T_ref[...]
    h2 = jnp.maximum(h2, 0.0)                                    # (H2, TILE_B)

    # output layer: N=1, so do it as a VPU multiply + sublane reduce instead of
    # an M=1 matmul; result is a lane-dense (1, TILE_B) row.
    out_ref[...] = jnp.sum(h2 * w3_ref[...], axis=0, keepdims=True) + b3_ref[...]


# ---------------------------------------------------------------------------
# Wrapper: gathers, feature fusion, Linear(1,E)->fc1 folding, pallas_call
# ---------------------------------------------------------------------------
def ncf_forward(params, customer_id, product_id, customer_type,
                purchasing_power, product_category, product_price,
                *, tile_b=256):
    E = params["customer_embedding"].shape[1]
    H1 = params["w1"].shape[1]
    H2 = params["w2"].shape[1]
    B = customer_id.shape[0]

    # --- glue: embedding-table gathers (data-dependent indexing) ---
    cust = params["customer_embedding"][customer_id]                 # (B, E)
    prod = params["product_embedding"][product_id]                   # (B, E)
    typ = params["customer_type_embedding"][customer_type]           # (B, E)
    cat = params["product_category_embedding"][product_category]     # (B, E)

    # fused feature slab: [cust | prod | type | cat | pp | price]  -> (B, 4E+2)
    x = jnp.concatenate(
        [cust, prod, typ, cat,
         purchasing_power[:, None].astype(jnp.float32),
         product_price[:, None].astype(jnp.float32)],
        axis=-1)

    F = 4 * E + 2
    F_pad = -(-F // 8) * 8                      # sublane-aligned feature dim
    B_pad = -(-B // tile_b) * tile_b            # lane-aligned (multiple of 256) batch
    x = jnp.pad(x, ((0, B_pad - B), (0, F_pad - F)))
    xT = x.T                                    # (F_pad, B_pad): batch on lanes

    # --- fold the two Linear(1, E) layers into fc1 (exact algebra) ---
    # w1 rows (PyTorch concat order): cust | prod | type | power | cat | price
    w1 = params["w1"]                           # (6E, H1)
    w1_cpt = w1[0:3 * E]
    w1_power = w1[3 * E:4 * E]
    w1_cat = w1[4 * E:5 * E]
    w1_price = w1[5 * E:6 * E]

    w_power_fc1 = params["w_power"] @ w1_power                   # (1, H1)
    w_price_fc1 = params["w_price"] @ w1_price                   # (1, H1)
    b1_eff = (params["b1"]
              + params["b_power"] @ w1_power
              + params["b_price"] @ w1_price)                    # (1, H1)

    w1_eff = jnp.concatenate([w1_cpt, w1_cat, w_power_fc1, w_price_fc1],
                             axis=0)                             # (4E+2, H1)
    w1_eff = jnp.pad(w1_eff, ((0, F_pad - F), (0, 0)))           # (F_pad, H1)

    # transposed weights/biases (features on lanes of the LHS)
    w1T = w1_eff.T                    # (H1, F_pad)
    b1T = b1_eff.T                    # (H1, 1)
    w2T = params["w2"].T              # (H2, H1)
    b2T = params["b2"].T              # (H2, 1)
    w3c = params["w3"]                # (H2, 1)
    b3c = params["b3"]                # (1, 1)

    grid = (B_pad // tile_b,)
    const = lambda i: (0, 0)          # resident weights: same block every step

    out = pl.pallas_call(
        ncf_mlp_kernel,
        out_shape=jax.ShapeDtypeStruct((1, B_pad), jnp.float32),
        grid_spec=pltpu.PrefetchScalarGridSpec(
            num_scalar_prefetch=0,
            grid=grid,
            in_specs=[
                pl.BlockSpec((F_pad, tile_b), lambda i: (0, i)),  # xT, batch-tiled
                pl.BlockSpec((H1, F_pad), const),                 # w1T
                pl.BlockSpec((H1, 1), const),                     # b1T
                pl.BlockSpec((H2, H1), const),                    # w2T
                pl.BlockSpec((H2, 1), const),                     # b2T
                pl.BlockSpec((H2, 1), const),                     # w3
                pl.BlockSpec((1, 1), const),                      # b3
            ],
            out_specs=pl.BlockSpec((1, tile_b), lambda i: (0, i)),
        ),
        compiler_params=pltpu.CompilerParams(
            dimension_semantics=("parallel",),
            vmem_limit_bytes=32 * 1024 * 1024,
        ),
    )(xT, w1T, b1T, w2T, b2T, w3c, b3c)

    # drop batch padding; torch .squeeze()
    return jnp.squeeze(out[0, :B])


# ---------------------------------------------------------------------------
# Deterministic parameter construction (matches nn.Module shapes)
# ---------------------------------------------------------------------------
def make_params(key, n_customers, n_products, embedding_dim, type_dim, category_dim):
    E = embedding_dim
    ks = jax.random.split(key, 14)

    def lin(kw, kb, fan_in, fan_out):
        # PyTorch Linear weight is (out, in); stored transposed (in, out) for x @ W.
        bound = 1.0 / float(fan_in) ** 0.5
        w = jax.random.uniform(kw, (fan_in, fan_out), jnp.float32, -bound, bound)
        b = jax.random.uniform(kb, (1, fan_out), jnp.float32, -bound, bound)
        return w, b

    w_power, b_power = lin(ks[4], ks[5], 1, E)
    w_price, b_price = lin(ks[6], ks[7], 1, E)
    w1, b1 = lin(ks[8], ks[9], 6 * E, 64)
    w2, b2 = lin(ks[10], ks[11], 64, 32)
    w3, b3 = lin(ks[12], ks[13], 32, 1)

    return {
        "customer_embedding": jax.random.normal(ks[0], (n_customers, E), jnp.float32),
        "product_embedding": jax.random.normal(ks[1], (n_products, E), jnp.float32),
        "customer_type_embedding": jax.random.normal(ks[2], (type_dim, E), jnp.float32),
        "product_category_embedding": jax.random.normal(ks[3], (category_dim, E), jnp.float32),
        "w_power": w_power, "b_power": b_power,
        "w_price": w_price, "b_price": b_price,
        "w1": w1, "b1": b1,
        "w2": w2, "b2": b2,
        "w3": w3, "b3": b3,
    }


# Pure-JAX reference (unfolded math) for a correctness check.
def ncf_reference(params, customer_id, product_id, customer_type,
                  purchasing_power, product_category, product_price):
    cust = params["customer_embedding"][customer_id]
    prod = params["product_embedding"][product_id]
    typ = params["customer_type_embedding"][customer_type]
    cat = params["product_category_embedding"][product_category]
    pp = purchasing_power[:, None]
    pr = product_price[:, None]
    power = pp @ params["w_power"] + params["b_power"]
    price = pr @ params["w_price"] + params["b_price"]
    x = jnp.concatenate([cust, prod, typ, power, cat, price], axis=-1)
    x = jnp.maximum(x @ params["w1"] + params["b1"], 0.0)
    x = jnp.maximum(x @ params["w2"] + params["b2"], 0.0)
    return jnp.squeeze(x @ params["w3"] + params["b3"])


if __name__ == "__main__":
    n_customers, n_products = 100, 50
    embedding_dim = 16
    type_dim, category_dim = 5, 7
    B = 8

    key = jax.random.PRNGKey(0)
    kp, k1, k2, k3, k4, k5, k6 = jax.random.split(key, 7)

    params = make_params(kp, n_customers, n_products, embedding_dim, type_dim, category_dim)

    customer_id = jax.random.randint(k1, (B,), 0, n_customers)
    product_id = jax.random.randint(k2, (B,), 0, n_products)
    customer_type = jax.random.randint(k3, (B,), 0, type_dim)
    purchasing_power = jax.random.uniform(k4, (B,), jnp.float32)
    product_category = jax.random.randint(k5, (B,), 0, category_dim)
    product_price = jax.random.uniform(k6, (B,), jnp.float32) * 10.0

    fwd = jax.jit(ncf_forward)
    out = fwd(params, customer_id, product_id, customer_type,
              purchasing_power, product_category, product_price)
    out = jax.block_until_ready(out)

    ref = ncf_reference(params, customer_id, product_id, customer_type,
                        purchasing_power, product_category, product_price)
    assert out.shape == (B,)
    assert jnp.allclose(out, ref, atol=2e-4, rtol=2e-4)

    print("KERNEL_OK")
</pallas_src>

<mosaic_0001>
module attributes {stable_mosaic.version = 11 : i64} {
  func.func @ncf_mlp_kernel(%arg0: i32, %arg1: memref<72x256xf32, #tpu.memory_space<vmem>>, %arg2: memref<64x72xf32, #tpu.memory_space<vmem>>, %arg3: memref<64x1xf32, #tpu.memory_space<vmem>>, %arg4: memref<32x64xf32, #tpu.memory_space<vmem>>, %arg5: memref<32x1xf32, #tpu.memory_space<vmem>>, %arg6: memref<32x1xf32, #tpu.memory_space<vmem>>, %arg7: memref<1x1xf32, #tpu.memory_space<vmem>>, %arg8: memref<1x256xf32, #tpu.memory_space<vmem>>) attributes {dimension_semantics = [#tpu.dimension_semantics<parallel>], iteration_bounds = array<i64: 1>, scalar_prefetch = 0 : i64, scratch_operands = 0 : i64, tpu.core_type = #tpu.core_type<tc>, window_params = [{transform_indices = @transform_0, window_bounds = array<i64: 72, 256>}, {pipeline_mode = #tpu.pipeline_mode<synchronous>, transform_indices = @transform_1, window_bounds = array<i64: 64, 72>}, {pipeline_mode = #tpu.pipeline_mode<synchronous>, transform_indices = @transform_2, window_bounds = array<i64: 64, 1>}, {pipeline_mode = #tpu.pipeline_mode<synchronous>, transform_indices = @transform_3, window_bounds = array<i64: 32, 64>}, {pipeline_mode = #tpu.pipeline_mode<synchronous>, transform_indices = @transform_4, window_bounds = array<i64: 32, 1>}, {pipeline_mode = #tpu.pipeline_mode<synchronous>, transform_indices = @transform_5, window_bounds = array<i64: 32, 1>}, {pipeline_mode = #tpu.pipeline_mode<synchronous>, transform_indices = @transform_6, window_bounds = array<i64: 1, 1>}, {transform_indices = @transform_7, window_bounds = array<i64: 1, 256>}]} {
    %c0 = arith.constant 0 : index
    %c0_0 = arith.constant 0 : index
    %0 = vector.load %arg2[%c0, %c0_0] : memref<64x72xf32, #tpu.memory_space<vmem>>, vector<64x72xf32>
    %c0_1 = arith.constant 0 : index
    %c0_2 = arith.constant 0 : index
    %1 = vector.load %arg1[%c0_1, %c0_2] : memref<72x256xf32, #tpu.memory_space<vmem>>, vector<72x256xf32>
    %cst = arith.constant dense<0.000000e+00> : vector<64x256xf32>
    %2 = tpu.matmul %0, %1, %cst {dimension_numbers = #tpu.dot_dimension_numbers<[1], [0], [0], [1], [0, 0, 1, 1], [], []>} : vector<64x72xf32>, vector<72x256xf32>, vector<64x256xf32> -> vector<64x256xf32>
    %c0_3 = arith.constant 0 : index
    %c0_4 = arith.constant 0 : index
    %3 = vector.load %arg3[%c0_3, %c0_4] : memref<64x1xf32, #tpu.memory_space<vmem>>, vector<64x1xf32>
    %4 = vector.broadcast %3 : vector<64x1xf32> to vector<64x256xf32>
    %5 = arith.addf %2, %4 : vector<64x256xf32>
    %cst_5 = arith.constant 0.000000e+00 : f32
    %6 = vector.broadcast %cst_5 : f32 to vector<64x256xf32>
    %7 = arith.maximumf %5, %6 : vector<64x256xf32>
    %c0_6 = arith.constant 0 : index
    %c0_7 = arith.constant 0 : index
    %8 = vector.load %arg4[%c0_6, %c0_7] : memref<32x64xf32, #tpu.memory_space<vmem>>, vector<32x64xf32>
    %cst_8 = arith.constant dense<0.000000e+00> : vector<32x256xf32>
    %9 = tpu.matmul %8, %7, %cst_8 {dimension_numbers = #tpu.dot_dimension_numbers<[1], [0], [0], [1], [0, 0, 1, 1], [], []>} : vector<32x64xf32>, vector<64x256xf32>, vector<32x256xf32> -> vector<32x256xf32>
    %c0_9 = arith.constant 0 : index
    %c0_10 = arith.constant 0 : index
    %10 = vector.load %arg5[%c0_9, %c0_10] : memref<32x1xf32, #tpu.memory_space<vmem>>, vector<32x1xf32>
    %11 = vector.broadcast %10 : vector<32x1xf32> to vector<32x256xf32>
    %12 = arith.addf %9, %11 : vector<32x256xf32>
    %cst_11 = arith.constant 0.000000e+00 : f32
    %13 = vector.broadcast %cst_11 : f32 to vector<32x256xf32>
    %14 = arith.maximumf %12, %13 : vector<32x256xf32>
    %c0_12 = arith.constant 0 : index
    %c0_13 = arith.constant 0 : index
    %15 = vector.load %arg6[%c0_12, %c0_13] : memref<32x1xf32, #tpu.memory_space<vmem>>, vector<32x1xf32>
    %16 = vector.broadcast %15 : vector<32x1xf32> to vector<32x256xf32>
    %17 = arith.mulf %14, %16 : vector<32x256xf32>
    %cst_14 = arith.constant dense<0.000000e+00> : vector<256xf32>
    %18 = vector.multi_reduction <add>, %17, %cst_14 [0] : vector<32x256xf32> to vector<256xf32>
    %19 = vector.shape_cast %18 : vector<256xf32> to vector<1x256xf32>
    %c0_15 = arith.constant 0 : index
    %c0_16 = arith.constant 0 : index
    %20 = vector.load %arg7[%c0_15, %c0_16] : memref<1x1xf32, #tpu.memory_space<vmem>>, vector<1x1xf32>
    %21 = vector.broadcast %20 : vector<1x1xf32> to vector<1x256xf32>
    %22 = arith.addf %19, %21 : vector<1x256xf32>
    %c0_17 = arith.constant 0 : index
    %c0_18 = arith.constant 0 : index
    %23 = vector.load %arg8[%c0_17, %c0_18] : memref<1x256xf32, #tpu.memory_space<vmem>>, vector<1x256xf32>
    tpu.vector_store %arg8[%c0_17, %c0_18], %22 {strides = array<i32>} : memref<1x256xf32, #tpu.memory_space<vmem>>, vector<1x256xf32>,
    return
  }
  func.func @transform_0(%arg0: i32) -> (i32, i32) {
    %c0_i32 = arith.constant 0 : i32
    %c0_i32_0 = arith.constant 0 : i32
    return %c0_i32, %arg0 : i32, i32
  }
  func.func @transform_1(%arg0: i32) -> (i32, i32) {
    %c0_i32 = arith.constant 0 : i32
    %c0_i32_0 = arith.constant 0 : i32
    %c0_i32_1 = arith.constant 0 : i32
    return %c0_i32, %c0_i32_0 : i32, i32
  }
  func.func @transform_2(%arg0: i32) -> (i32, i32) {
    %c0_i32 = arith.constant 0 : i32
    %c0_i32_0 = arith.constant 0 : i32
    %c0_i32_1 = arith.constant 0 : i32
    return %c0_i32, %c0_i32_0 : i32, i32
  }
  func.func @transform_3(%arg0: i32) -> (i32, i32) {
    %c0_i32 = arith.constant 0 : i32
    %c0_i32_0 = arith.constant 0 : i32
    %c0_i32_1 = arith.constant 0 : i32
    return %c0_i32, %c0_i32_0 : i32, i32
  }
  func.func @transform_4(%arg0: i32) -> (i32, i32) {
    %c0_i32 = arith.constant 0 : i32
    %c0_i32_0 = arith.constant 0 : i32
    %c0_i32_1 = arith.constant 0 : i32
    return %c0_i32, %c0_i32_0 : i32, i32
  }
  func.func @transform_5(%arg0: i32) -> (i32, i32) {
    %c0_i32 = arith.constant 0 : i32
    %c0_i32_0 = arith.constant 0 : i32
    %c0_i32_1 = arith.constant 0 : i32
    return %c0_i32, %c0_i32_0 : i32, i32
  }
  func.func @transform_6(%arg0: i32) -> (i32, i32) {
    %c0_i32 = arith.constant 0 : i32
    %c0_i32_0 = arith.constant 0 : i32
    %c0_i32_1 = arith.constant 0 : i32
    return %c0_i32, %c0_i32_0 : i32, i32
  }
  func.func @transform_7(%arg0: i32) -> (i32, i32) {
    %c0_i32 = arith.constant 0 : i32
    %c0_i32_0 = arith.constant 0 : i32
    return %c0_i32, %arg0 : i32, i32
  }
}

</mosaic_0001>

<bundles_post_ra>
// kernel: ncf_forward.1
= control target key start
LH: loop header
LB: loop body
LE: loop exit
PB: predicated region body
PF: predicated region fallthrough
CT: control target
= control target key end

     0   :  { %v500_v3 = vmov 0.0   ;;  %v501_v4 = vmov 0   ;;  %vm102_vm0 = vcmask 588800   ;;  %vm284_vm1 = vcmask 523264   ;;  %s707_s0 = inlined_call_operand.vmem [shape: f32[72,256], index: 0, kind: input, shape index: {}]   ;;  %s708_s6 = inlined_call_operand.<no memory space> [shape: f32[1,1], index: 6, kind: input, shape index: {}]   ;;  %s709_s2 = inlined_call_operand.vmem [shape: f32[64,1], index: 2, kind: input, shape index: {}]   ;;  %s710_s1 = inlined_call_operand.vmem [shape: f32[64,72], index: 1, kind: input, shape index: {}]   ;;  %s711_s4 = inlined_call_operand.vmem [shape: f32[32,1], index: 4, kind: input, shape index: {}]   ;;  %s712_s5 = inlined_call_operand.vmem [shape: f32[32,1], index: 5, kind: input, shape index: {}]   ;;  %s713_s3 = inlined_call_operand.vmem [shape: f32[32,64], index: 3, kind: input, shape index: {}]   ;;  %s714_s7 = inlined_call_operand.vmem [shape: f32[1,256], index: 7, kind: output, shape index: {}]  }
   0x1   :  { %v53_v0 = vld [vmem:[%s707_s0 + $0x88] sm:$0xff]  ;;  %v52_v1 = vld [vmem:[%s707_s0 + $0x80] sm:$0xff]  ;;  %v51_v2 = vld [vmem:[%s707_s0 + $0x78] sm:$0xff]  ;;  %191 = vmatprep.mubr.f32.mxu0 %v500_v3  ;;  %499 = vset.pattern.permute.xlu1 %v501_v4  ;;  %v12_v5 = vstv %s708_s6 }
   0x2   :  { %141 = vmatprep.subr.mxu0 %v53_v0  ;;  %v50_v6 = vld [vmem:[%s707_s0 + $0x70] sm:$0xff]  ;;  %498 = vset.pattern.permute.xlu0 %v501_v4  ;;  %13 = vst [vmem:[#allocation2] sm:$0x1] %v12_v5  ;;  %v49_v7 = vld [vmem:[%s707_s0 + $0x68] sm:$0xff]  ;;  %v48_v8 = vld [vmem:[%s707_s0 + $0x60] sm:$0xff] }
   0x3   :  { %142 = vmatpush1.msra.mxu0 %v52_v1  ;;  %361 = vmatprep.mubr.f32.mxu1 %v500_v3  ;;  %v47_v9 = vld [vmem:[%s707_s0 + $0x58] sm:$0xff]  ;;  %v46_v10 = vld [vmem:[%s707_s0 + $0x50] sm:$0xff]  ;;  %v45_v11 = vld [vmem:[%s707_s0 + $0x48] sm:$0xff] }
   0x4   :  { %143 = vmatprep.subr.mxu0 %v51_v2  ;;  %v44_v12 = vld [vmem:[%s707_s0 + $0x40] sm:$0xff]  ;;  %v43_v13 = vld [vmem:[%s707_s0 + $0x38] sm:$0xff]  ;;  %v59_v14 = vld [vmem:[%s709_s2 + $0x28] sm:$0xff] }
   0x5   :  { %144 = vmatpush1.msra.mxu0 %v50_v6  ;;  %v42_v15 = vld [vmem:[%s707_s0 + $0x30] sm:$0xff]  ;;  %89 = vperm.xlu1 %499, %v59_v14   ;;  %v61_v16 = vld [vmem:[%s709_s2 + $0x38] sm:$0xff]  ;;  %v41_v17 = vld [vmem:[%s707_s0 + $0x28] sm:$0xff] }
   0x6   :  { %145 = vmatprep.subr.mxu0 %v49_v7  ;;  %99 = vperm.xlu0 %498, %v61_v16   ;;  %v58_v18 = vld [vmem:[%s709_s2 + $0x20] sm:$0xff]  ;;  %v60_v20 = vld [vmem:[%s709_s2 + $0x30] sm:$0xff]  ;;  %v39_v21 = vld [vmem:[%s707_s0 + $0x18] sm:$0xff] }
   0x7   :  { %146 = vmatpush1.msra.mxu0 %v48_v8  ;;  %v40_v19 = vld [vmem:[%s707_s0 + $0x20] sm:$0xff]  ;;  %v38_v22 = vld [vmem:[%s707_s0 + $0x10] sm:$0xff]  ;;  %v37_v23 = vld [vmem:[%s707_s0 + $0x8] sm:$0xff] }
   0x8   :  { %147 = vmatprep.subr.mxu0 %v47_v9  ;;  %v56_v24 = vld [vmem:[%s709_s2 + $0x10] sm:$0xff]  ;;  %v36_v25 = vld [vmem:[%s707_s0] sm:$0xff]  ;;  %v57_v26 = vld [vmem:[%s709_s2 + $0x18] sm:$0xff] }
   0x9   :  { %148 = vmatpush1.msra.mxu0 %v46_v10  ;;  %84 = vperm.xlu1 %499, %v58_v18   ;;  %v28_v27 = vld [vmem:[%s710_s1] sm:$0xff]  ;;  %v55_v29 = vld [vmem:[%s709_s2 + $0x8] sm:$0xff]  ;;  %v30_v33 = vld [vmem:[%s710_s1 + $0x10] sm:$0xff] }
   0xa   :  { %149 = vmatprep.subr.mxu0 %v45_v11  ;;  %94 = vperm.xlu0 %498, %v60_v20   ;;  %v54_v28 = vld [vmem:[%s709_s2] sm:$0xff]  ;;  %v29_v30 = vld [vmem:[%s710_s1 + $0x8] sm:$0xff]  ;;  %v263_v34 = vld [vmem:[%s711_s4 + $0x18] sm:$0xff] }
   0xb   :  { %150 = vmatpush1.msra.mxu0 %v44_v12  ;;  %v261_v31 = vld [vmem:[%s711_s4 + $0x8] sm:$0xff]  ;;  %v260_v32 = vld [vmem:[%s711_s4] sm:$0xff]  ;;  %v262_v35 = vld [vmem:[%s711_s4 + $0x10] sm:$0xff] }
   0xc   :  { %151 = vmatprep.subr.mxu0 %v43_v13  ;;  %v31_v36 = vld [vmem:[%s710_s1 + $0x18] sm:$0xff]  ;;  %v395_v37 = vld [vmem:[%s712_s5 + $0x8] sm:$0xff]  ;;  %v394_v38 = vld [vmem:[%s712_s5] sm:$0xff] }
   0xd   :  { %152 = vmatpush1.msra.mxu0 %v42_v15  ;;  %74 = vperm.xlu1 %499, %v56_v24   ;;  %v32_v39 = vld [vmem:[%s710_s1 + $0x20] sm:$0xff]  ;;  %v397_v40 = vld [vmem:[%s712_s5 + $0x18] sm:$0xff]  ;;  %v396_v41 = vld [vmem:[%s712_s5 + $0x10] sm:$0xff] }
   0xe   :  { %153 = vmatprep.subr.mxu0 %v41_v17  ;;  %79 = vperm.xlu0 %498, %v57_v26   ;;  %v33_v42 = vld [vmem:[%s710_s1 + $0x28] sm:$0xff]  ;;  %v444_v43 = vld [vmem:[#allocation2] sm:$0x1]  ;;  %v34_v44 = vld [vmem:[%s710_s1 + $0x30] sm:$0xff] }
   0xf   :  { %154 = vmatpush1.msra.mxu0 %v40_v19  ;;  %v35_v45 = vld [vmem:[%s710_s1 + $0x38] sm:$0xff] }
  0x10   :  { %155 = vmatprep.subr.mxu0 %v39_v21 }
  0x11   :  { %156 = vmatpush1.msra.mxu0 %v38_v22  ;;  %64 = vperm.xlu1 %499, %v54_v28  }
  0x12   :  { %157 = vmatprep.subr.mxu0 %v37_v23  ;;  %69 = vperm.xlu0 %498, %v55_v29  }
  0x13   :  { %158 = vmatpush1.msra.mxu0 %v36_v25 }
  0x14   :  { %483 = vmatmul.mubr.msk.f32.vlgmr.msra.gmra.mxu0 %vm102_vm0, %v28_v27 }
  0x15   :  { %197 = vmatprep.mubr.f32.mxu0 %v500_v3  ;;  %271 = vperm.xlu1 %499, %v261_v31  }
  0x16   :  { %266 = vperm.xlu0 %498, %v260_v32  }
  0x18   :  { %484 = vmatmul.mubr.msk.f32.gmra.mxu0 %vm102_vm0, %v29_v30 }
  0x19   :  { %203 = vmatprep.mubr.f32.mxu0 %v500_v3  ;;  %281 = vperm.xlu1 %499, %v263_v34  }
  0x1a   :  { %276 = vperm.xlu0 %498, %v262_v35  }
  0x1c   :  { %485 = vmatmul.mubr.msk.f32.gmra.mxu0 %vm102_vm0, %v30_v33 }
  0x1d   :  { %209 = vmatprep.mubr.f32.mxu0 %v500_v3  ;;  %405 = vperm.xlu1 %499, %v395_v37  }
  0x1e   :  { %400 = vperm.xlu0 %498, %v394_v38  }
  0x20   :  { %486 = vmatmul.mubr.msk.f32.gmra.mxu0 %vm102_vm0, %v31_v36 }
  0x21   :  { %215 = vmatprep.mubr.f32.mxu0 %v500_v3  ;;  %415 = vperm.xlu1 %499, %v397_v40   ;;  %v257_v40 = vld [vmem:[%s713_s3 + $0x8] sm:$0xff] }
  0x22   :  { %410 = vperm.xlu0 %498, %v396_v41   ;;  %v258_v41 = vld [vmem:[%s713_s3 + $0x10] sm:$0xff] }
  0x24   :  { %487 = vmatmul.mubr.msk.f32.gmra.mxu0 %vm102_vm0, %v32_v39  ;;  %v256_v39 = vld [vmem:[%s713_s3] sm:$0xff] }
  0x25   :  { %221 = vmatprep.mubr.f32.mxu0 %v500_v3 }
  0x26   :  { %447 = vperm.xlu0 %498, %v444_v43  }
  0x28   :  { %488 = vmatmul.mubr.msk.f32.gmra.mxu0 %vm102_vm0, %v33_v42  ;;  %v259_v42 = vld [vmem:[%s713_s3 + $0x18] sm:$0xff] }
  0x29   :  { %227 = vmatprep.mubr.f32.mxu0 %v500_v3 }
  0x2c   :  { %489 = vmatmul.mubr.msk.f32.gmra.mxu0 %vm102_vm0, %v34_v44 }
  0x2d   :  { %233 = vmatprep.mubr.f32.mxu0 %v500_v3 }
  0x30   :  { %490 = vmatmul.mubr.msk.f32.gmra.mxu0 %vm102_vm0, %v35_v45 }
  0x80   :  { %v90_v59 = vpop.permute.xlu1 %89 }
  0x81   :  { %v100_v57 = vpop.permute.xlu0 %99 }
  0x84   :  { %v85_v0 = vpop.permute.xlu1 %84 }
  0x85   :  { %v95_v62 = vpop.permute.xlu0 %94 }
  0x88   :  { %v75_v12 = vpop.permute.xlu1 %74 }
  0x89   :  { %v80_v7 = vpop.permute.xlu0 %79 }
  0x8c   :  { %v65_v26 = vpop.permute.xlu1 %64 }
  0x8d   :  { %v70_v21 = vpop.permute.xlu0 %69 }
  0x90   :  { %v272_v44 = vpop.permute.xlu1 %271 }
  0x91   :  { %v267_v43 = vpop.permute.xlu0 %266 }
  0x95   :  { %v277_v45 = vpop.permute.xlu0 %276 }
  0xd4   :  { %v193_v46 = vpop.f32.mrf.mxu0 }
  0xd5   :  { %v194_v33 = vadd.f32 %v193_v46, %v65_v26 }
  0xd6   :  { %v195_v47 = vpop.f32.mrf.mxu0 }
  0xd7   :  { %v196_v31 = vadd.f32 %v195_v47, %v65_v26  ;;  %v240_v38 = vmax.f32 %v194_v33, 0.0 }
  0xd8   :  { %v199_v48 = vpop.f32.mrf.mxu0 }
  0xd9   :  { %v200_v29 = vadd.f32 %v199_v48, %v70_v21  ;;  %v241_v37 = vmax.f32 %v196_v31, 0.0  ;;  %v282_v48 = vpop.permute.xlu1 %281 }
  0xda   :  { %v201_v49 = vpop.f32.mrf.mxu0 }
  0xdb   :  { %v202_v27 = vadd.f32 %v201_v49, %v70_v21  ;;  %v242_v36 = vmax.f32 %v200_v29, 0.0 }
  0xdc   :  { %v205_v50 = vpop.f32.mrf.mxu0 }
  0xdd   :  { %v206_v24 = vadd.f32 %v205_v50, %v75_v12  ;;  %v243_v35 = vmax.f32 %v202_v27, 0.0 }
  0xde   :  { %v207_v51 = vpop.f32.mrf.mxu0 }
  0xdf   :  { %v208_v22 = vadd.f32 %v207_v51, %v75_v12  ;;  %v244_v34 = vmax.f32 %v206_v24, 0.0  ;;  %v450_v24 = vlaneseq }
  0xe0   :  { %v211_v52 = vpop.f32.mrf.mxu0 }
  0xe1   :  { %v212_v19 = vadd.f32 %v211_v52, %v80_v7  ;;  %v245_v32 = vmax.f32 %v208_v22, 0.0  ;;  %v401_v52 = vpop.permute.xlu0 %400  ;;  %v451_v29 = vshrl.u32 %v450_v24, 7  ;;  %vm476_vm2 = vcmp.lt.s32.totalorder %v450_v24, 256 }
  0xe2   :  { %v213_v53 = vpop.f32.mrf.mxu0 }
  0xe3   :  { %v214_v17 = vadd.f32 %v213_v53, %v80_v7  ;;  %v246_v30 = vmax.f32 %v212_v19, 0.0 }
  0xe4   :  { %v217_v54 = vpop.f32.mrf.mxu0 }
  0xe5   :  { %v218_v15 = vadd.f32 %v217_v54, %v85_v0  ;;  %v247_v28 = vmax.f32 %v214_v17, 0.0 }
  0xe6   :  { %v219_v55 = vpop.f32.mrf.mxu0 }
  0xe7   :  { %v220_v13 = vadd.f32 %v219_v55, %v85_v0  ;;  %v248_v25 = vmax.f32 %v218_v15, 0.0 }
  0xe8   :  { %v223_v56 = vpop.f32.mrf.mxu0 }
  0xe9   :  { %v224_v10 = vadd.f32 %v223_v56, %v90_v59  ;;  %v249_v23 = vmax.f32 %v220_v13, 0.0 }
  0xea   :  { %v225_v58 = vpop.f32.mrf.mxu0 }
  0xeb   :  { %v226_v8 = vadd.f32 %v225_v58, %v90_v59  ;;  %v250_v20 = vmax.f32 %v224_v10, 0.0 }
  0xec   :  { %v229_v60 = vpop.f32.mrf.mxu0 }
  0xed   :  { %v230_v6 = vadd.f32 %v229_v60, %v95_v62  ;;  %v251_v18 = vmax.f32 %v226_v8, 0.0  ;;  %v406_v60 = vpop.permute.xlu1 %405 }
  0xee   :  { %v231_v61 = vpop.f32.mrf.mxu0 }
  0xef   :  { %v232_v4 = vadd.f32 %v231_v61, %v95_v62  ;;  %v252_v16 = vmax.f32 %v230_v6, 0.0 }
  0xf0   :  { %v235_v63 = vpop.f32.mrf.mxu0 }
  0xf1   :  { %v236_v1 = vadd.f32 %v235_v63, %v100_v57  ;;  %v253_v14 = vmax.f32 %v232_v4, 0.0 }
  0xf2   :  { %v237_v2 = vpop.f32.mrf.mxu0 }
  0xf3   :  { %v238_v5 = vadd.f32 %v237_v2, %v100_v57  ;;  %v254_v11 = vmax.f32 %v236_v1, 0.0  ;;  %v411_v2 = vpop.permute.xlu0 %410 }
  0xf5   :  { %v255_v9 = vmax.f32 %v238_v5, 0.0 }
  0xf7   :  { %313 = vmatprep.subr.mxu1 %v255_v9 }
  0xf8   :  { %314 = vmatpush1.msra.mxu1 %v254_v11 }
  0xf9   :  { %315 = vmatprep.subr.mxu1 %v253_v14 }
  0xfa   :  { %316 = vmatpush1.msra.mxu1 %v252_v16  ;;  %v416_v16 = vpop.permute.xlu1 %415 }
  0xfb   :  { %317 = vmatprep.subr.mxu1 %v251_v18 }
  0xfc   :  { %318 = vmatpush1.msra.mxu1 %v250_v20 }
  0xfd   :  { %319 = vmatprep.subr.mxu1 %v249_v23 }
  0xfe   :  { %320 = vmatpush1.msra.mxu1 %v248_v25 }
  0xff   :  { %321 = vmatprep.subr.mxu1 %v247_v28 }
 0x100   :  { %322 = vmatpush1.msra.mxu1 %v246_v30 }
 0x101   :  { %323 = vmatprep.subr.mxu1 %v245_v32  ;;  %v502_v32 = vmov 1966171168  }
 0x102   :  { %324 = vmatpush1.msra.mxu1 %v244_v34  ;;  %v460_v33 = vunpack.c.l.s4 %v502_v32 }
 0x103   :  { %325 = vmatprep.subr.mxu1 %v243_v35 }
 0x104   :  { %326 = vmatpush1.msra.mxu1 %v242_v36  ;;  %v452_v36 = vsub.s32 0, %v451_v29 }
 0x105   :  { %327 = vmatprep.subr.mxu1 %v241_v37 }
 0x106   :  { %328 = vmatpush1.msra.mxu1 %v240_v38 }
 0x107   :  { %491 = vmatmul.mubr.msk.f32.vlgmr.msra.gmra.mxu1 %vm284_vm1, %v256_v39  ;;  %v448_v39 = vpop.permute.xlu0 %447 }
 0x108   :  { %367 = vmatprep.mubr.f32.mxu1 %v500_v3 }
 0x10b   :  { %492 = vmatmul.mubr.msk.f32.gmra.mxu1 %vm284_vm1, %v257_v40  ;;  %v461_v40 = vunpack.c.0.s8 %v460_v33 }
 0x10c   :  { %373 = vmatprep.mubr.f32.mxu1 %v500_v3 }
 0x10f   :  { %493 = vmatmul.mubr.msk.f32.gmra.mxu1 %vm284_vm1, %v258_v41 }
 0x110   :  { %379 = vmatprep.mubr.f32.mxu1 %v500_v3 }
 0x113   :  { %494 = vmatmul.mubr.msk.f32.gmra.mxu1 %vm284_vm1, %v259_v42 }
 0x1c7   :  { %v363_v46 = vpop.f32.mrf.mxu1 }
 0x1c8   :  { %v364_v49 = vadd.f32 %v363_v46, %v267_v43 }
 0x1c9   :  { %v365_v47 = vpop.f32.mrf.mxu1 }
 0x1ca   :  { %v366_v53 = vadd.f32 %v365_v47, %v267_v43  ;;  %v386_v3 = vmax.f32 %v364_v49, 0.0  ;;  %v453_v43 = vrot.slane %v448_v39, %v452_v36 }
 0x1cb   :  { %v369_v50 = vpop.f32.mrf.mxu1 }
 0x1cc   :  { %v370_v51 = vadd.f32 %v369_v50, %v272_v44  ;;  %v387_v61 = vmax.f32 %v366_v53, 0.0  ;;  %v418_v4 = vmul.f32 %v401_v52, %v386_v3 }
 0x1cd   :  { %v371_v54 = vpop.f32.mrf.mxu1 }
 0x1ce   :  { %v388_v55 = vmax.f32 %v370_v51, 0.0  ;;  %v372_v56 = vadd.f32 %v371_v54, %v272_v44  ;;  %v419_v10 = vmul.f32 %v401_v52, %v387_v61 }
 0x1cf   :  { %v375_v57 = vpop.f32.mrf.mxu1 }
 0x1d0   :  { %v389_v58 = vmax.f32 %v372_v56, 0.0  ;;  %v376_v59 = vadd.f32 %v375_v57, %v277_v45  ;;  %v420_v63 = vmul.f32 %v406_v60, %v388_v55 }
 0x1d1   :  { %v377_v62 = vpop.f32.mrf.mxu1 }
 0x1d2   :  { %v390_v0 = vmax.f32 %v376_v59, 0.0  ;;  %v378_v1 = vadd.f32 %v377_v62, %v277_v45  ;;  %v421_v6 = vmul.f32 %v406_v60, %v389_v58  ;;  %v426_v12 = vadd.f32 %v420_v63, %v418_v4 }
 0x1d3   :  { %v381_v5 = vpop.f32.mrf.mxu1  ;;  %v464_v45 = vsub.s32 %v461_v40, %v451_v29 }
 0x1d4   :  { %v422_v7 = vmul.f32 %v411_v2, %v390_v0  ;;  %v391_v8 = vmax.f32 %v378_v1, 0.0  ;;  %v382_v9 = vadd.f32 %v381_v5, %v282_v48  ;;  %v435_v17 = vadd.f32 %v421_v6, %v419_v10 }
 0x1d5   :  { %v383_v11 = vpop.f32.mrf.mxu1 }
 0x1d6   :  { %v423_v13 = vmul.f32 %v411_v2, %v391_v8  ;;  %v392_v14 = vmax.f32 %v382_v9, 0.0  ;;  %v384_v15 = vadd.f32 %v383_v11, %v282_v48  ;;  %v427_v18 = vadd.f32 %v426_v12, %v422_v7 }
 0x1d8   :  { %v424_v19 = vmul.f32 %v416_v16, %v392_v14  ;;  %v393_v20 = vmax.f32 %v384_v15, 0.0  ;;  %v436_v21 = vadd.f32 %v435_v17, %v423_v13 }
 0x1da   :  { %v428_v22 = vadd.f32 %v427_v18, %v424_v19  ;;  %v425_v23 = vmul.f32 %v416_v16, %v393_v20 }
 0x1dc   :  { %v429_v25 = vrot.slane %v428_v22, 4  ;;  %v437_v26 = vadd.f32 %v436_v21, %v425_v23 }
 0x1de   :  { %v430_v27 = vadd.f32 %v429_v25, %v428_v22  ;;  %v438_v28 = vrot.slane %v437_v26, 4 }
 0x1e0   :  { %v431_v30 = vrot.slane %v430_v27, 2  ;;  %v439_v31 = vadd.f32 %v438_v28, %v437_v26 }
 0x1e2   :  { %v432_v34 = vadd.f32 %v431_v30, %v430_v27  ;;  %v440_v35 = vrot.slane %v439_v31, 2 }
 0x1e4   :  { %v433_v37 = vrot.slane %v432_v34, 1  ;;  %v441_v38 = vadd.f32 %v440_v35, %v439_v31 }
 0x1e6   :  { %v434_v41 = vadd.f32 %v433_v37, %v432_v34  ;;  %v442_v42 = vrot.slane %v441_v38, 1 }
 0x1e8   :  { %v443_v44 = vadd.f32 %v442_v42, %v441_v38  ;;  %v454_v46 = vadd.f32 %v453_v43, %v434_v41 }
 0x1ea   :  { %v455_v47 = vadd.f32 %v453_v43, %v443_v44 }
 0x1ec   :  { %v458_v48 = vcombine.low %v454_v46, %v455_v47 }
 0x1ee   :  { %v465_v49 = vrot.slane %v458_v48, %v464_v45 }
 0x1f0   :  { %v472_v50 = vrot.slane %v465_v49, %v464_v45 }
 0x1f2   :  { %478 = vst.msk [vmem:[%s714_s7] sm:$0x3] %vm476_vm2, %v472_v50 }

</bundles_post_ra>
